<compile_context>
chip_gen: v7x
topology: tpu7x:2x2x1
jax: 0.10.0
libtpu: 0.0.40
codegen_flags: <defaults>
</compile_context>

<pallas_src>
import jax
import jax.numpy as jnp
from jax import lax
from jax.experimental import pallas as pl
from jax.experimental.pallas import tpu as pltpu


def single_inference_kernel(scal_ref,      # SMEM (4,): [b_max, m_max, b2, 0]
                            bd_ref,        # VMEM (2, N): rows [b, diagonal]
                            mt_ref,        # VMEM (N, N): M^T (unscaled, duplicates summed)
                            w_ref,         # VMEM (H, 4): cols [w1[0], w1[1], b1, w2]
                            y_ref):        # VMEM (1, N): lane-dense output
    hp = lax.Precision.HIGHEST

    b_max = scal_ref[0]
    m_max = scal_ref[1]
    b2 = scal_ref[2]
    inv_bmax = 1.0 / b_max                 # scalar reciprocals; vector ops are multiplies
    inv_mmax = 1.0 / m_max

    b_row = bd_ref[0:1, :]                 # (1, N)
    d_row = bd_ref[1:2, :]                 # (1, N)
    x0 = b_row * inv_bmax                  # feature 0: b / ||b||_inf        (row)
    x1 = d_row * inv_mmax                  # feature 1: diag / ||M||_inf     (row)

    mt = mt_ref[...]                       # (N, N) UNSCALED M^T — single resident copy

    w1c0 = w_ref[:, 0:1]                   # (H, 1)
    w1c1 = w_ref[:, 1:2]                   # (H, 1)
    b1c = w_ref[:, 2:3]                    # (H, 1)
    w2c = w_ref[:, 3:4] * inv_mmax         # (H, 1), 2nd 1/m_max folded here

    # ---- synthetic GCN in transposed (row) form:  A_s = M/m_max ----
    # xw^T with the first 1/m_max folded in, so the MXU consumes the unscaled M^T.
    xwT = (w1c0 * x0 + w1c1 * x1) * inv_mmax                                   # (H, N)
    hT = jnp.maximum(
        jnp.dot(xwT, mt, preferred_element_type=jnp.float32, precision=hp) + b1c,
        0.0)                                                                   # (H, N)
    zT = jnp.sum(hT * w2c, axis=0, keepdims=True)                              # (1, N)
    y_row = jnp.dot(zT, mt, preferred_element_type=jnp.float32,
                    precision=hp) + b2                                         # (1, N) = y_dir^T

    # ---- p^T = y_dir^T @ M^T  (width-1 matvec on the otherwise-idle MXU) ----
    p_row = jnp.dot(y_row, mt, preferred_element_type=jnp.float32, precision=hp)  # (1, N)

    # ---- scaler = clamp_min(<p,b>/<p,p>, 1e-16) ; y_hat (lane-dense row) ----
    p_sq = jnp.sum(p_row * p_row)
    bp = jnp.sum(p_row * b_row)
    # TODO(synk): like the PyTorch original, p_sq == 0 yields inf/nan before the clamp.
    scaler = jnp.maximum(bp / p_sq, 1e-16)
    y_ref[...] = y_row * scaler                                                # full-width vst


def single_inference(b, m_indices, m_values, params):
    """Glue: densify COO matrix (as M^T), extract diagonal, inf-norms, call kernel."""
    n = b.shape[0]
    dtype = jnp.float32
    b = b.astype(dtype)
    m_values = m_values.astype(dtype)

    rows, cols = m_indices[0], m_indices[1]
    # PyTorch builds `diagonal` with a plain index assignment (last write wins for duplicate
    # diagonal indices) while torch.mv on the COO tensor sums duplicates — keep both behaviors.
    diag_mask = rows == cols
    diag_idx = jnp.where(diag_mask, rows, n)
    diagonal = jnp.zeros((n,), dtype).at[diag_idx].set(m_values, mode="drop")
    # Build M^T directly (swapped scatter indices): the kernel works entirely with
    # row-vectors times M^T, so no transpose is ever materialized anywhere.
    mt_dense = jnp.zeros((n, n), dtype).at[cols, rows].add(m_values)
    # TODO(synk): for genuinely large sparse problems keep CSR and do an in-kernel SpMM
    #             (PrefetchScalarGridSpec row offsets + manual make_async_copy) instead of
    #             this O(N^2) densification round-trip through HBM.

    b_max = jnp.max(jnp.abs(b))
    m_max = jnp.max(jnp.abs(m_values))

    w1, b1, w2, b2 = params["w1"], params["b1"], params["w2"], params["b2"]
    hidden = w1.shape[1]

    # Packed operands: one SMEM scalar vector, one (2,N) feature array, one (H,4) weight array.
    scalars = jnp.stack([b_max, m_max, jnp.asarray(b2, dtype), jnp.zeros((), dtype)])
    bd = jnp.stack([b, diagonal])                                     # (2, N)
    w_packed = jnp.stack([w1[0].astype(dtype), w1[1].astype(dtype),
                          b1.astype(dtype), w2.astype(dtype)], axis=1)  # (H, 4)

    smem_spec = pl.BlockSpec(memory_space=pltpu.MemorySpace.SMEM)
    vmem_spec = pl.BlockSpec(memory_space=pltpu.MemorySpace.VMEM)

    # VMEM budget: one unscaled dense M^T + small packed vectors/weights, with headroom.
    # Cap at 48 MiB so Mosaic internal scratch / pipelining still fit on v7x's 64 MiB VMEM.
    vmem_need = n * n * 4 + 32 * n * 4 + 64 * hidden * 4
    vmem_limit = int(min(48 << 20, max(2 * vmem_need, 16 << 20)))

    cost = pl.CostEstimate(
        flops=2 * n * n * (hidden + 2) + 12 * n * hidden,
        transcendentals=0,
        bytes_accessed=n * n * 4 + 4 * n * 4 + 5 * hidden * 4,
    )

    y = pl.pallas_call(
        single_inference_kernel,
        out_shape=jax.ShapeDtypeStruct((1, n), dtype),
        in_specs=[smem_spec, vmem_spec, vmem_spec, vmem_spec],
        out_specs=vmem_spec,
        compiler_params=pltpu.CompilerParams(vmem_limit_bytes=vmem_limit),
        cost_estimate=cost,
    )(scalars, bd, mt_dense, w_packed)
    return y.reshape(n)


def single_inference_reference(b, m_indices, m_values, params):
    """Pure-JAX reference (PyTorch-order math) for validation."""
    n = b.shape[0]
    dtype = jnp.float32
    hp = lax.Precision.HIGHEST
    b = b.astype(dtype)
    m_values = m_values.astype(dtype)
    rows, cols = m_indices[0], m_indices[1]
    diag_mask = rows == cols
    diag_idx = jnp.where(diag_mask, rows, n)
    diagonal = jnp.zeros((n,), dtype).at[diag_idx].set(m_values, mode="drop")
    m_dense = jnp.zeros((n, n), dtype).at[rows, cols].add(m_values)
    b_max = jnp.max(jnp.abs(b))
    m_max = jnp.max(jnp.abs(m_values))
    x0, x1 = b / b_max, diagonal / m_max
    m_s = m_dense / m_max
    w1, b1, w2, b2 = params["w1"], params["b1"], params["w2"], params["b2"]
    xw = x0[:, None] * w1[0][None, :] + x1[:, None] * w1[1][None, :]
    h = jnp.maximum(jnp.dot(m_s, xw, precision=hp) + b1[None, :], 0.0)
    ah = jnp.dot(m_s, h, precision=hp)
    y_dir = jnp.sum(ah * w2[None, :], axis=1) + b2
    p = jnp.dot(m_dense, y_dir, precision=hp)
    scaler = jnp.maximum(jnp.dot(p, b, precision=hp) / jnp.dot(p, p, precision=hp), 1e-16)
    return y_dir * scaler


if __name__ == "__main__":
    key = jax.random.PRNGKey(0)
    n, hidden, nnz_off = 128, 32, 256
    k1, k2, k3, k4, k5, k6, k7 = jax.random.split(key, 7)

    # Sparse matrix: full diagonal (diagonally dominant) plus random off-diagonal entries.
    rows_off = jax.random.randint(k1, (nnz_off,), 0, n)
    cols_off = jax.random.randint(k2, (nnz_off,), 0, n)
    vals_off = 0.1 * jax.random.normal(k3, (nnz_off,), dtype=jnp.float32)
    diag_vals = 2.0 + jax.random.uniform(k4, (n,), dtype=jnp.float32)
    m_indices = jnp.stack([jnp.concatenate([jnp.arange(n), rows_off]),
                           jnp.concatenate([jnp.arange(n), cols_off])]).astype(jnp.int32)
    m_values = jnp.concatenate([diag_vals, vals_off])
    b = jax.random.normal(k5, (n,), dtype=jnp.float32)

    # Deterministic synthetic GCN weights (2 -> hidden -> 1).
    params = {
        "w1": 0.1 * jax.random.normal(k6, (2, hidden), dtype=jnp.float32),
        "b1": 0.01 * jnp.ones((hidden,), dtype=jnp.float32),
        "w2": 0.1 * jax.random.normal(k7, (hidden,), dtype=jnp.float32),
        "b2": jnp.float32(0.01),
    }

    y_hat = jax.block_until_ready(single_inference(b, m_indices, m_values, params))
    y_ref = single_inference_reference(b, m_indices, m_values, params)

    assert y_hat.shape == (n,)
    assert bool(jnp.all(jnp.isfinite(y_hat)))
    assert bool(jnp.allclose(y_hat, y_ref, rtol=1e-4, atol=1e-5)), (
        f"mismatch: max abs err {jnp.max(jnp.abs(y_hat - y_ref))}")
    print("KERNEL_OK")
</pallas_src>

<mosaic_0001>
module attributes {stable_mosaic.version = 11 : i64} {
  func.func @single_inference_kernel(%arg0: memref<4xf32, #tpu.memory_space<smem>>, %arg1: memref<2x128xf32, #tpu.memory_space<vmem>>, %arg2: memref<128x128xf32, #tpu.memory_space<vmem>>, %arg3: memref<32x4xf32, #tpu.memory_space<vmem>>, %arg4: memref<1x128xf32, #tpu.memory_space<vmem>>) attributes {dimension_semantics = [], scalar_prefetch = 0 : i64, scratch_operands = 0 : i64, tpu.core_type = #tpu.core_type<tc>} {
    %c0 = arith.constant 0 : index
    %0 = memref.load %arg0[%c0] : memref<4xf32, #tpu.memory_space<smem>>
    %c1 = arith.constant 1 : index
    %1 = memref.load %arg0[%c1] : memref<4xf32, #tpu.memory_space<smem>>
    %c2 = arith.constant 2 : index
    %2 = memref.load %arg0[%c2] : memref<4xf32, #tpu.memory_space<smem>>
    %cst = arith.constant 1.000000e+00 : f32
    %3 = arith.divf %cst, %0 : f32
    %cst_0 = arith.constant 1.000000e+00 : f32
    %4 = arith.divf %cst_0, %1 : f32
    %c0_1 = arith.constant 0 : index
    %c0_2 = arith.constant 0 : index
    %5 = vector.load %arg1[%c0_1, %c0_2] : memref<2x128xf32, #tpu.memory_space<vmem>>, vector<1x128xf32>
    %c1_3 = arith.constant 1 : index
    %c0_4 = arith.constant 0 : index
    %6 = vector.load %arg1[%c1_3, %c0_4] : memref<2x128xf32, #tpu.memory_space<vmem>>, vector<1x128xf32>
    %7 = vector.broadcast %3 : f32 to vector<1x128xf32>
    %8 = arith.mulf %5, %7 : vector<1x128xf32>
    %9 = vector.broadcast %4 : f32 to vector<1x128xf32>
    %10 = arith.mulf %6, %9 : vector<1x128xf32>
    %c0_5 = arith.constant 0 : index
    %c0_6 = arith.constant 0 : index
    %11 = vector.load %arg2[%c0_5, %c0_6] : memref<128x128xf32, #tpu.memory_space<vmem>>, vector<128x128xf32>
    %c0_7 = arith.constant 0 : index
    %c0_8 = arith.constant 0 : index
    %12 = vector.load %arg3[%c0_7, %c0_8] : memref<32x4xf32, #tpu.memory_space<vmem>>, vector<32x1xf32>
    %c0_9 = arith.constant 0 : index
    %c1_10 = arith.constant 1 : index
    %13 = vector.load %arg3[%c0_9, %c1_10] : memref<32x4xf32, #tpu.memory_space<vmem>>, vector<32x1xf32>
    %c0_11 = arith.constant 0 : index
    %c2_12 = arith.constant 2 : index
    %14 = vector.load %arg3[%c0_11, %c2_12] : memref<32x4xf32, #tpu.memory_space<vmem>>, vector<32x1xf32>
    %c0_13 = arith.constant 0 : index
    %c3 = arith.constant 3 : index
    %15 = vector.load %arg3[%c0_13, %c3] : memref<32x4xf32, #tpu.memory_space<vmem>>, vector<32x1xf32>
    %16 = vector.broadcast %4 : f32 to vector<32x1xf32>
    %17 = arith.mulf %15, %16 : vector<32x1xf32>
    %18 = vector.broadcast %12 : vector<32x1xf32> to vector<32x128xf32>
    %19 = vector.broadcast %8 : vector<1x128xf32> to vector<32x128xf32>
    %20 = arith.mulf %18, %19 : vector<32x128xf32>
    %21 = vector.broadcast %13 : vector<32x1xf32> to vector<32x128xf32>
    %22 = vector.broadcast %10 : vector<1x128xf32> to vector<32x128xf32>
    %23 = arith.mulf %21, %22 : vector<32x128xf32>
    %24 = arith.addf %20, %23 : vector<32x128xf32>
    %25 = vector.broadcast %4 : f32 to vector<32x128xf32>
    %26 = arith.mulf %24, %25 : vector<32x128xf32>
    %cst_14 = arith.constant dense<0.000000e+00> : vector<32x128xf32>
    %27 = tpu.matmul %26, %11, %cst_14 {dimension_numbers = #tpu.dot_dimension_numbers<[1], [0], [0], [1], [0, 0, 1, 1], [], []>, precision = #tpu.contract_precision<fp32>} : vector<32x128xf32>, vector<128x128xf32>, vector<32x128xf32> -> vector<32x128xf32>
    %28 = vector.broadcast %14 : vector<32x1xf32> to vector<32x128xf32>
    %29 = arith.addf %27, %28 : vector<32x128xf32>
    %cst_15 = arith.constant 0.000000e+00 : f32
    %30 = vector.broadcast %cst_15 : f32 to vector<32x128xf32>
    %31 = arith.maximumf %29, %30 : vector<32x128xf32>
    %32 = vector.broadcast %17 : vector<32x1xf32> to vector<32x128xf32>
    %33 = arith.mulf %31, %32 : vector<32x128xf32>
    %cst_16 = arith.constant dense<0.000000e+00> : vector<128xf32>
    %34 = vector.multi_reduction <add>, %33, %cst_16 [0] : vector<32x128xf32> to vector<128xf32>
    %35 = vector.shape_cast %34 : vector<128xf32> to vector<1x128xf32>
    %cst_17 = arith.constant dense<0.000000e+00> : vector<1x128xf32>
    %36 = tpu.matmul %35, %11, %cst_17 {dimension_numbers = #tpu.dot_dimension_numbers<[1], [0], [0], [1], [0, 0, 1, 1], [], []>, precision = #tpu.contract_precision<fp32>} : vector<1x128xf32>, vector<128x128xf32>, vector<1x128xf32> -> vector<1x128xf32>
    %37 = vector.broadcast %2 : f32 to vector<1x128xf32>
    %38 = arith.addf %36, %37 : vector<1x128xf32>
    %cst_18 = arith.constant dense<0.000000e+00> : vector<1x128xf32>
    %39 = tpu.matmul %38, %11, %cst_18 {dimension_numbers = #tpu.dot_dimension_numbers<[1], [0], [0], [1], [0, 0, 1, 1], [], []>, precision = #tpu.contract_precision<fp32>} : vector<1x128xf32>, vector<128x128xf32>, vector<1x128xf32> -> vector<1x128xf32>
    %40 = arith.mulf %39, %39 : vector<1x128xf32>
    %41 = vector.shape_cast %40 : vector<1x128xf32> to vector<1x1x128xf32>
    %cst_19 = arith.constant dense<0.000000e+00> : vector<1xf32>
    %42 = vector.multi_reduction <add>, %41, %cst_19 [1, 2] : vector<1x1x128xf32> to vector<1xf32>
    %43 = vector.shape_cast %42 : vector<1xf32> to vector<1x1x1xf32>
    %44 = vector.extract %43[0, 0, 0] : f32 from vector<1x1x1xf32>
    %45 = arith.mulf %39, %5 : vector<1x128xf32>
    %46 = vector.shape_cast %45 : vector<1x128xf32> to vector<1x1x128xf32>
    %cst_20 = arith.constant dense<0.000000e+00> : vector<1xf32>
    %47 = vector.multi_reduction <add>, %46, %cst_20 [1, 2] : vector<1x1x128xf32> to vector<1xf32>
    %48 = vector.shape_cast %47 : vector<1xf32> to vector<1x1x1xf32>
    %49 = vector.extract %48[0, 0, 0] : f32 from vector<1x1x1xf32>
    %50 = arith.divf %49, %44 : f32
    %cst_21 = arith.constant 1.000000e-16 : f32
    %51 = arith.maximumf %50, %cst_21 : f32
    %52 = vector.broadcast %51 : f32 to vector<1x128xf32>
    %53 = arith.mulf %38, %52 : vector<1x128xf32>
    %c0_22 = arith.constant 0 : index
    %c0_23 = arith.constant 0 : index
    %54 = vector.load %arg4[%c0_22, %c0_23] : memref<1x128xf32, #tpu.memory_space<vmem>>, vector<1x128xf32>
    tpu.vector_store %arg4[%c0_22, %c0_23], %53 {strides = array<i32>} : memref<1x128xf32, #tpu.memory_space<vmem>>, vector<1x128xf32>,
    return
  }
}

</mosaic_0001>

<bundles_post_ra>
// kernel: tpu_custom_call.1
= control target key start
LH: loop header
LB: loop body
LE: loop exit
PB: predicated region body
PF: predicated region fallthrough
CT: control target
= control target key end

     0   :  { %9 = vsyncpa [#allocation5], 0  ;;  %s4592_s0 = inlined_call_operand.vmem [shape: f32[4], index: 0, kind: input, shape index: {}]   ;;  %s4593_s1 = inlined_call_operand.vmem [shape: f32[2,128], index: 1, kind: input, shape index: {}]   ;;  %s4594_s2 = inlined_call_operand.hbm [shape: f32[128,128], index: 2, kind: input, shape index: {}]   ;;  %s4595_s3 = inlined_call_operand.vmem [shape: f32[32,4], index: 3, kind: input, shape index: {}]   ;;  %s4596_s4 = inlined_call_operand.hbm [shape: f32[1,128], index: 4, kind: output, shape index: {}]  }
   0x1   :  { %10 = vsyncpa [#allocation3], 0 }
   0x2   :  { %11 = vsyncpa [#allocation4], 0  ;;  %s18_s17 = sshll.u32 %s4592_s0, 4  ;;  %s19_s17 = int_to_ptr.vmem [resolvable:$true] %s18_s17 }
   0x3   :  { %s3834_s18 = scalar_lea.vmem %s19_s17, 16  ;;  %p3839_p1 = scmp.lt.s32.totalorder %s19_s17, %s19_s17 }
   0x4   :  { %p3835_p0 = scmp.ne.s32.totalorder %s19_s17, %s3834_s18  ;;  %p3840_p2 = scmp.lt.s32.totalorder %s3834_s18, %s3834_s18 }
   0x6   :  { %p3841_p3 = por %p3840_p2, %p3839_p1 }
   0x8   :  { %p3842_p4 = pnand %p3841_p3, %p3835_p0 }
   0xa   :  { %3845 = shalt.err (!%p3842_p4)
}
   0xb   :  { %s3896_s19 = smov [#allocation2]   ;;  %s3897_s20 = smov [#allocation6]  }
   0xc   :  { %21 = dma.vmem_to_smem %s19_s17, 16, %s3896_s19, [#allocation5]  }
   0xd   :  { %s29_s21 = sshll.u32 %s3897_s20, 4  ;;  %s3846_s24 = scalar_lea.hbm %s4594_s2, 2048  ;;  %s30_s21 = int_to_ptr.vmem [resolvable:$true] %s29_s21 }
   0xe   :  { %p3847_p5 = scmp.ne.s32.totalorder %s4594_s2, %s3846_s24  ;;  %p3850_p6 = scmp.lt.u32.totalorder %s3846_s24, %s4594_s2 }
  0x10   :  { %p3852_p7 = pnand %p3850_p6, %p3847_p5 }
  0x12   :  { %3855 = shalt.err (!%p3852_p7)
}
  0x13   :  { %s3856_s28 = scalar_lea.vmem %s30_s21, 2048  ;;  %p3861_p9 = scmp.lt.s32.totalorder %s30_s21, %s30_s21 }
  0x14   :  { %p3857_p8 = scmp.ne.s32.totalorder %s30_s21, %s3856_s28  ;;  %p3862_p10 = scmp.lt.s32.totalorder %s3856_s28, %s3856_s28 }
  0x16   :  { %p3863_p11 = por %p3862_p10, %p3861_p9 }
  0x18   :  { %p3864_p12 = pnand %p3863_p11, %p3857_p8 }
  0x1a   :  { %3867 = shalt.err (!%p3864_p12)
}
  0x1b   :  { %s3898_s29 = smov 128   ;;  %s3899_s30 = smov 8  }
  0x1c   :  { %35 = dma.hbm_to_vmem [thread:$0]  %s4594_s2, 2048, %s30_s21, [#allocation3], %s3898_s29, %s3898_s29, %s3899_s30  }
  0x1d   :  { %3890 = dma.done.wait [#allocation5], 16  }
  0x1e   :  { %3891 = vsyncadd [#allocation5], 4294967280 }
  0x1f   :  { %3892 = dma.done.wait [#allocation3], 2048  }
  0x20   :  { %3893 = vsyncadd [#allocation3], 4294965248 }
  0x21   :  { %44 = sfence }
  0x22   :  { %v3952_v0 = vld [vmem:[%s4595_s3 + $0x8] sm:$0xff]  ;;  %v3957_v1 = vld [vmem:[%s4595_s3] sm:$0xff]  ;;  %v3900_v2 = vmov 0   ;;  %s45_s11 = sld [smem:[#allocation2]]  ;;  %s2297_s2 = sld [smem:[#allocation2 + $0x1]]  ;;  %v62_v6 = vld [vmem:[#allocation6 + $0x10] sm:$0xff] }
  0x23   :  { %3821 = vset.pattern.permute.xlu1 %v3900_v2  ;;  %3819 = vset.pattern.permute.xlu0 %v3900_v2  ;;  %v60_v3 = vld [vmem:[#allocation6] sm:$0xff]  ;;  %v3961_v4 = vld [vmem:[#allocation6 + $0x8] sm:$0xff]  ;;  %v3963_v7 = vld [vmem:[#allocation6 + $0x18] sm:$0xff]  ;;  %v167_v9 = vand.u32 4294901760, %v62_v6  ;;  %v3901_v14 = vmov 1   ;;  %v3902_v43 = vmov 2  }
  0x24   :  { %91 = vperm.xlu1 %3821, %v3952_v0   ;;  %86 = vperm.xlu0 %3819, %v3957_v1   ;;  %v161_v5 = vand.u32 4294901760, %v60_v3  ;;  %v164_v8 = vand.u32 4294901760, %v3961_v4  ;;  %v170_v10 = vand.u32 4294901760, %v3963_v7  ;;  %v3967_v11 = vld [vmem:[#allocation6 + $0x20] sm:$0xff]  ;;  %v3969_v12 = vld [vmem:[#allocation6 + $0x28] sm:$0xff]  ;;  %v3981_v20 = vld [vmem:[#allocation6 + $0x30] sm:$0xff] }
  0x25   :  { %v173_v16 = vand.u32 4294901760, %v3967_v11  ;;  %v176_v17 = vand.u32 4294901760, %v3969_v12  ;;  %v3983_v21 = vld [vmem:[#allocation6 + $0x38] sm:$0xff]  ;;  %v3988_v22 = vld [vmem:[%s4595_s3 + $0x10] sm:$0xff]  ;;  %v179_v24 = vand.u32 4294901760, %v3981_v20  ;;  %v4005_v26 = vld [vmem:[#allocation6 + $0x40] sm:$0xff]  ;;  %v4051_v41 = vsub.f32 %v62_v6, %v167_v9 }
  0x26   :  { %v3973_v13 = vpack.c.bf16 %v164_v8, %v161_v5  ;;  %v3975_v15 = vpack.c.bf16 %v170_v10, %v167_v9  ;;  %v182_v25 = vand.u32 4294901760, %v3983_v21  ;;  %v4007_v27 = vld [vmem:[#allocation6 + $0x48] sm:$0xff]  ;;  %v4013_v28 = vld [vmem:[%s4595_s3 + $0x18] sm:$0xff]  ;;  %v185_v30 = vand.u32 4294901760, %v4005_v26  ;;  %v4028_v32 = vld [vmem:[#allocation6 + $0x50] sm:$0xff]  ;;  %s3907_s25 = smov [#allocation7]  }
  0x27   :  { %v4000_v23 = vpack.c.bf16 %v176_v17, %v173_v16  ;;  %v188_v31 = vand.u32 4294901760, %v4007_v27  ;;  %v4030_v33 = vld [vmem:[#allocation6 + $0x58] sm:$0xff]  ;;  %v4035_v34 = vld [vmem:[#allocation6 + $0x60] sm:$0xff]  ;;  %v4037_v35 = vld [vmem:[#allocation6 + $0x68] sm:$0xff]  ;;  %v4039_v36 = vsub.f32 %v60_v3, %v161_v5  ;;  %v191_v39 = vand.u32 4294901760, %v4028_v32  ;;  %s2287_s26 = sshll.u32 %s3907_s25, 4  ;;  %s2288_s26 = int_to_ptr.vmem [resolvable:$true] %s2287_s26 }
  0x28   :  { %3822 = vset.pattern.permute.xlu1 %v3901_v14  ;;  %3820 = vset.pattern.permute.xlu0 %v3901_v14  ;;  %v48_v18 = vstv %s45_s11  ;;  %v51_v19 = vstv %s2297_s2  ;;  %v4023_v29 = vpack.c.bf16 %v182_v25, %v179_v24  ;;  %v194_v40 = vand.u32 4294901760, %v4030_v33  ;;  %v4067_v49 = vld [vmem:[#allocation6 + $0x70] sm:$0xff]  ;;  %v4079_v53 = vld [vmem:[#allocation6 + $0x78] sm:$0xff]  ;;  %s3908_s0 = smov 1e-16   ;;  %s3868_s28 = scalar_lea.vmem %s2288_s26, 16 }
  0x29   :  { %117 = vperm.xlu1 %3822, %v3952_v0   ;;  %113 = vperm.xlu0 %3820, %v3957_v1   ;;  %3828 = vrcp.f32 %v48_v18  ;;  %v4047_v38 = vpack.c.bf16 %v188_v31, %v185_v30  ;;  %v4056_v44 = vsub.f32 %v3961_v4, %v164_v8  ;;  %v4059_v45 = vsub.f32 %v3963_v7, %v170_v10  ;;  %p3869_p13 = scmp.ne.s32.totalorder %s2288_s26, %s3868_s28  ;;  %s3872_s29 = scalar_lea.vmem %s2288_s26, 32 }
  0x2a   :  { %3368 = vmatprep.subr.bf16.mxu0 %v3973_v13  ;;  %3272 = vmatprep.subr.bf16.mxu1 %v3973_v13  ;;  %3830 = vrcp.f32 %v51_v19  ;;  %v197_v46 = vand.u32 4294901760, %v4035_v34  ;;  %v200_v47 = vand.u32 4294901760, %v4037_v35  ;;  %v298_v48 = vand.u32 4294901760, %v4051_v41  ;;  %p3873_p0 = scmp.lt.s32.totalorder %s2288_s26, %s2288_s26  ;;  %p3874_p1 = scmp.lt.s32.totalorder %s3872_s29, %s3868_s28 }
  0x2b   :  { %3370 = vmatpush3.bf16.msra.mxu0 %v3973_v13  ;;  %3274 = vmatpush3.bf16.msra.mxu1 %v3973_v13  ;;  %v284_v50 = vand.u32 4294901760, %v4039_v36  ;;  %v305_v51 = vand.u32 4294901760, %v4059_v45  ;;  %v4077_v52 = vpack.c.bf16 %v194_v40, %v191_v39  ;;  %v4085_v55 = vsub.f32 %v3967_v11, %v173_v16 }
  0x2c   :  { %3372 = vmatprep.subr.bf16.mxu0 %v3975_v15  ;;  %3276 = vmatprep.subr.bf16.mxu1 %v3975_v15  ;;  %v299_v54 = vsub.f32 %v4051_v41, %v298_v48  ;;  %v291_v56 = vand.u32 4294901760, %v4056_v44  ;;  %v4095_v59 = vsub.f32 %v3969_v12, %v176_v17  ;;  %v3903_v60 = vmov 3   ;;  %p3875_p2 = por %p3874_p1, %p3873_p0 }
  0x2d   :  { %3823 = vset.pattern.permute.xlu1 %v3900_v2  ;;  %121 = vperm.xlu0 %3820, %v3988_v22   ;;  %v4089_v57 = vpack.c.bf16 %v305_v51, %v298_v48  ;;  %v306_v58 = vsub.f32 %v4059_v45, %v305_v51  ;;  %v4101_v61 = vpack.c.bf16 %v200_v47, %v197_v46  ;;  %v203_v62 = vand.u32 4294901760, %v4067_v49 }
  0x2e   :  { %96 = vperm.xlu1 %3823, %v3988_v22   ;;  %v300_v63 = vand.u32 4294901760, %v299_v54  ;;  %v312_v2 = vand.u32 4294901760, %v4085_v55  ;;  %v206_v3 = vand.u32 4294901760, %v4079_v53  ;;  %v285_v4 = vsub.f32 %v4039_v36, %v284_v50  ;;  %p3876_p3 = pnand %p3875_p2, %p3869_p13 }
  0x2f   :  { %3374 = vmatpush3.bf16.msra.mxu0 %v3975_v15  ;;  %3278 = vmatpush3.bf16.msra.mxu1 %v3975_v15  ;;  %v307_v5 = vand.u32 4294901760, %v306_v58  ;;  %v319_v6 = vand.u32 4294901760, %v4095_v59  ;;  %v4116_v8 = vsub.f32 %v3981_v20, %v179_v24  ;;  %v4121_v9 = vsub.f32 %v3983_v21, %v182_v25 }
  0x30   :  { %3376 = vmatprep.subr.bf16.mxu0 %v4000_v23  ;;  %3280 = vmatprep.subr.bf16.mxu1 %v4000_v23  ;;  %v313_v7 = vsub.f32 %v4085_v55, %v312_v2  ;;  %v292_v10 = vsub.f32 %v4056_v44, %v291_v56  ;;  %v4138_v19 = vpack.c.bf16 %v206_v3, %v203_v62  ;;  %v286_v21 = vand.u32 4294901760, %v285_v4 }
  0x31   :  { %125 = vperm.xlu0 %3820, %v4013_v28   ;;  %v4125_v11 = vpack.c.bf16 %v307_v5, %v300_v63  ;;  %v4127_v12 = vpack.c.bf16 %v319_v6, %v312_v2  ;;  %v320_v14 = vsub.f32 %v4095_v59, %v319_v6  ;;  %v326_v17 = vand.u32 4294901760, %v4116_v8 }
  0x32   :  { %101 = vperm.xlu1 %3823, %v4013_v28   ;;  %v314_v16 = vand.u32 4294901760, %v313_v7  ;;  %v333_v18 = vand.u32 4294901760, %v4121_v9  ;;  %v339_v48 = vsub.f32 %v4005_v26, %v185_v30  ;;  %v346_v51 = vsub.f32 %v4007_v27, %v188_v31 }
  0x33   :  { %3378 = vmatpush3.bf16.msra.mxu0 %v4000_v23  ;;  %3282 = vmatpush3.bf16.msra.mxu1 %v4000_v23  ;;  %v3829_v37 = vpop.eup %3828  ;;  %v321_v20 = vand.u32 4294901760, %v320_v14  ;;  %v327_v25 = vsub.f32 %v4116_v8, %v326_v17  ;;  %v4156_v63 = vpack.c.bf16 %v291_v56, %v284_v50  ;;  %v353_v26 = vsub.f32 %v4028_v32, %v191_v39 }
  0x34   :  { %3380 = vmatprep.subr.bf16.mxu0 %v4023_v29  ;;  %3284 = vmatprep.subr.bf16.mxu1 %v4023_v29  ;;  %v3831_v42 = vpop.eup %3830  ;;  %3796 = vpush %v3829_v37  ;;  %v4142_v24 = vpack.c.bf16 %v333_v18, %v326_v17  ;;  %v334_v37 = vsub.f32 %v4121_v9, %v333_v18  ;;  %v340_v2 = vand.u32 4294901760, %v339_v48  ;;  %v347_v4 = vand.u32 4294901760, %v346_v51 }
  0x35   :  { %3825 = vset.pattern.permute.xlu0 %v3902_v43  ;;  %3798 = vpush %v3831_v42  ;;  %v293_v42 = vand.u32 4294901760, %v292_v10  ;;  %v328_v54 = vand.u32 4294901760, %v327_v25  ;;  %v360_v27 = vsub.f32 %v4030_v33, %v194_v40  ;;  %v367_v14 = vsub.f32 %v4035_v34, %v197_v46 }
  0x36   :  { %3824 = vset.pattern.permute.xlu1 %v3902_v43  ;;  %149 = vperm.xlu0 %3825, %v3952_v0   ;;  %v4147_v43 = vpack.c.bf16 %v321_v20, %v314_v16  ;;  %v335_v58 = vand.u32 4294901760, %v334_v37  ;;  %v4171_v31 = vpack.c.bf16 %v347_v4, %v340_v2  ;;  %v341_v50 = vsub.f32 %v339_v48, %v340_v2 }
  0x37   :  { %145 = vperm.xlu1 %3824, %v3957_v1   ;;  %3382 = vmatpush3.bf16.msra.mxu0 %v4023_v29  ;;  %v4169_v30 = vpack.c.bf16 %v293_v42, %v286_v21  ;;  %v348_v56 = vsub.f32 %v346_v51, %v347_v4  ;;  %v361_v6 = vand.u32 4294901760, %v360_v27  ;;  %v374_v16 = vsub.f32 %v4037_v35, %v200_v47 }
  0x38   :  { %3384 = vmatprep.subr.bf16.mxu0 %v4047_v38  ;;  %3286 = vmatpush3.bf16.msra.mxu1 %v4023_v29  ;;  %v4160_v5 = vpack.c.bf16 %v335_v58, %v328_v54  ;;  %v342_v7 = vand.u32 4294901760, %v341_v50  ;;  %v368_v20 = vand.u32 4294901760, %v367_v14  ;;  %v381_v37 = vsub.f32 %v4067_v49, %v203_v62 }
  0x39   :  { %3288 = vmatprep.subr.bf16.mxu1 %v4047_v38  ;;  %v349_v10 = vand.u32 4294901760, %v348_v56  ;;  %v362_v39 = vsub.f32 %v360_v27, %v361_v6  ;;  %v375_v21 = vand.u32 4294901760, %v374_v16  ;;  %v388_v42 = vsub.f32 %v4079_v53, %v206_v3 }
  0x3a   :  { %3826 = vset.pattern.permute.xlu0 %v3903_v60  ;;  %v369_v34 = vsub.f32 %v367_v14, %v368_v20  ;;  %v382_v58 = vand.u32 4294901760, %v381_v37  ;;  %v4205_v53 = vpack.c.bf16 %v4056_v44, %v4039_v36  ;;  %v4209_v3 = vpack.c.bf16 %v4059_v45, %v4051_v41 }
  0x3b   :  { %153 = vperm.xlu1 %3824, %v3988_v22   ;;  %3386 = vmatpush3.bf16.msra.mxu0 %v4047_v38  ;;  %v4179_v40 = vpack.c.bf16 %v349_v10, %v342_v7  ;;  %v363_v18 = vand.u32 4294901760, %v362_v39  ;;  %v4195_v54 = vpack.c.bf16 %v375_v21, %v368_v20  ;;  %v376_v46 = vsub.f32 %v374_v16, %v375_v21 }
  0x3c   :  { %3388 = vmatprep.subr.bf16.mxu0 %v4077_v52  ;;  %3290 = vmatpush3.bf16.msra.mxu1 %v4047_v38  ;;  %v389_v35 = vand.u32 4294901760, %v388_v42  ;;  %v370_v47 = vand.u32 4294901760, %v369_v34  ;;  %v383_v50 = vsub.f32 %v381_v37, %v382_v58  ;;  %v4213_v7 = vpack.c.bf16 %v4095_v59, %v4085_v55 }
  0x3d   :  { %3292 = vmatprep.subr.bf16.mxu1 %v4077_v52  ;;  %v377_v2 = vand.u32 4294901760, %v376_v46  ;;  %v4217_v10 = vpack.c.bf16 %v4121_v9, %v4116_v8  ;;  %v4219_v39 = vpack.c.bf16 %v346_v51, %v339_v48  ;;  %v4225_v55 = vpack.c.bf16 %v360_v27, %v353_v26 }
  0x3e   :  { %v4197_v4 = vpack.c.bf16 %v389_v35, %v382_v58  ;;  %v390_v56 = vsub.f32 %v388_v42, %v389_v35  ;;  %v4227_v59 = vpack.c.bf16 %v374_v16, %v367_v14  ;;  %v4229_v8 = vpack.c.bf16 %v388_v42, %v381_v37 }
  0x3f   :  { %157 = vperm.xlu1 %3824, %v4013_v28   ;;  %3390 = vmatpush3.bf16.msra.mxu0 %v4077_v52  ;;  %v104_v9 = vlaneseq  ;;  %vm3905_vm0 = vmmov 0   ;;  %vm2251_vm1 = vcmask 1040384  }
  0x40   :  { %3392 = vmatprep.subr.bf16.mxu0 %v4101_v61  ;;  %3294 = vmatpush3.bf16.msra.mxu1 %v4077_v52  ;;  %v391_v49 = vand.u32 4294901760, %v390_v56 }
  0x41   :  { %3296 = vmatprep.subr.bf16.mxu1 %v4101_v61  ;;  %v105_v48 = vshrl.u32 %v104_v9, 7 }
  0x43   :  { %3827 = vset.pattern.permute.xlu1 %v3903_v60  ;;  %3394 = vmatpush3.bf16.msra.mxu0 %v4101_v61  ;;  %v354_v60 = vand.u32 4294901760, %v353_v26  ;;  %v106_v51 = vsub.s32 0, %v105_v48 }
  0x44   :  { %3396 = vmatprep.subr.bf16.mxu0 %v4138_v19  ;;  %3298 = vmatpush3.bf16.msra.mxu1 %v4101_v61 }
  0x45   :  { %3300 = vmatprep.subr.bf16.mxu1 %v4138_v19  ;;  %v4176_v32 = vpack.c.bf16 %v361_v6, %v354_v60  ;;  %v355_v33 = vsub.f32 %v353_v26, %v354_v60  ;;  %v4199_v60 = vpack.c.bf16 %v377_v2, %v370_v47  ;;  %v384_v6 = vand.u32 4294901760, %v383_v50 }
  0x47   :  { %3398 = vmatpush3.bf16.msra.mxu0 %v4138_v19  ;;  %v356_v17 = vand.u32 4294901760, %v355_v33  ;;  %v4201_v62 = vpack.c.bf16 %v391_v49, %v384_v6 }
  0x48   :  { %3400 = vmatprep.subr.bf16.mxu0 %v4156_v63  ;;  %3302 = vmatpush3.bf16.msra.mxu1 %v4138_v19 }
  0x49   :  { %3304 = vmatprep.subr.bf16.mxu1 %v4169_v30  ;;  %v4187_v25 = vpack.c.bf16 %v363_v18, %v356_v17 }
  0x65   :  { %s3797_s3 = spop %3796 }
  0x66   :  { %s3799_s16 = spop %3798 }
  0x67   :  { %v58_v33 = vstv %s3799_s16 }
  0x68   :  { %v81_v36 = vmul.f32 %v3952_v0, %v58_v33  ;;  %v80_v44 = vmul.f32 %v3957_v1, %v58_v33  ;;  %v82_v41 = vmul.f32 %v3988_v22, %v58_v33  ;;  %v83_v45 = vmul.f32 %v4013_v28, %v58_v33  ;;  %v4234_v0 = vld [vmem:[%s4593_s1] sm:$0x1]  ;;  %v55_v22 = vld [vmem:[%s4593_s1 + $0x1] sm:$0x1]  ;;  %s2298_s1 = sld [smem:[#allocation2 + $0x2]] }
  0x69   :  { %v56_v1 = vstv %s3797_s3  ;;  %v59_v26 = vmul.f32 %v58_v33, %v55_v22 }
  0x6a   :  { %941 = vperm.xlu1 %3827, %v81_v36   ;;  %936 = vperm.xlu0 %3826, %v80_v44   ;;  %v57_v28 = vmul.f32 %v56_v1, %v4234_v0 }
  0x6b   :  { %v131_v17 = vrot.slane %v59_v26, %v106_v51 }
  0x6c   :  { %v107_v16 = vrot.slane %v57_v28, %v106_v51 }
  0x6e   :  { %946 = vperm.xlu1 %3827, %v82_v41   ;;  %951 = vperm.xlu0 %3826, %v83_v45  }
  0xa3   :  { %v87_v27 = vpop.permute.xlu0 %86  ;;  %v92_v14 = vpop.permute.xlu1 %91 }
  0xa4   :  { %v108_v21 = vmul.f32 %v107_v16, %v87_v27  ;;  %v109_v37 = vmul.f32 %v107_v16, %v92_v14 }
  0xa8   :  { %v118_v18 = vpop.permute.xlu1 %117  ;;  %v114_v20 = vpop.permute.xlu0 %113 }
  0xa9   :  { %v133_v42 = vmul.f32 %v131_v17, %v118_v18  ;;  %v132_v34 = vmul.f32 %v131_v17, %v114_v20 }
  0xab   :  { %v137_v46 = vadd.f32 %v133_v42, %v109_v37  ;;  %v136_v58 = vadd.f32 %v132_v34, %v108_v21 }
  0xac   :  { %v122_v35 = vpop.permute.xlu0 %121 }
  0xad   :  { %v141_v47 = vmul.f32 %v137_v46, %v58_v33  ;;  %v140_v2 = vmul.f32 %v136_v58, %v58_v33  ;;  %v134_v50 = vmul.f32 %v131_v17, %v122_v35  ;;  %v97_v56 = vpop.permute.xlu1 %96 }
  0xae   :  { %v110_v6 = vmul.f32 %v107_v16, %v97_v56  ;;  %v3906_v56 = vmov 0.0  }
  0xaf   :  { %v4240_v49 = vand.u32 4294901760, %v141_v47  ;;  %v4242_v36 = vand.u32 4294901760, %v140_v2 }
  0xb0   :  { %v138_v44 = vadd.f32 %v134_v50, %v110_v6  ;;  %v126_v41 = vpop.permute.xlu0 %125  ;;  %v3904_v50 = vmov 0.0|0.0  }
  0xb1   :  { %v4245_v45 = vsub.f32 %v141_v47, %v4240_v49  ;;  %v135_v9 = vmul.f32 %v131_v17, %v126_v41  ;;  %v102_v48 = vpop.permute.xlu1 %101  ;;  %v4248_v1 = vsub.f32 %v140_v2, %v4242_v36 }
  0xb2   :  { %v142_v22 = vmul.f32 %v138_v44, %v58_v33  ;;  %v111_v28 = vmul.f32 %v107_v16, %v102_v48 }
  0xb3   :  { %v243_v51 = vand.u32 4294901760, %v4248_v1  ;;  %v253_v26 = vand.u32 4294901760, %v4245_v45 }
  0xb4   :  { %v4252_v27 = vand.u32 4294901760, %v142_v22  ;;  %v139_v14 = vadd.f32 %v135_v9, %v111_v28 }
  0xb5   :  { %2769 = vmatprep.mubr.f32.mxu0 %v243_v51  ;;  %v244_v18 = vsub.f32 %v4248_v1, %v243_v51  ;;  %v254_v20 = vsub.f32 %v4245_v45, %v253_v26 }
  0xb6   :  { %v4257_v17 = vsub.f32 %v142_v22, %v4252_v27  ;;  %v143_v21 = vmul.f32 %v139_v14, %v58_v33  ;;  %2770 = vmatmul.mubr.f32.vlgmr.msra.gmra.mrb[0].mxu0 %v253_v26  ;;  %v146_v6 = vpop.permute.xlu1 %145 }
  0xb7   :  { %3402 = vmatpush3.bf16.msra.mxu0 %v4156_v63  ;;  %v245_v16 = vand.u32 4294901760, %v244_v18  ;;  %v255_v37 = vand.u32 4294901760, %v254_v20 }
  0xb8   :  { %v4260_v42 = vand.u32 4294901760, %v143_v21  ;;  %3404 = vmatprep.subr.bf16.mxu0 %v4089_v57  ;;  %v263_v34 = vand.u32 4294901760, %v4257_v17 }
  0xb9   :  { %2655 = vmatprep.mubr.f32.mxu1 %v245_v16 }
  0xba   :  { %v4265_v46 = vsub.f32 %v143_v21, %v4260_v42  ;;  %2656 = vmatmul.mubr.f32.vlgmr.msra.gmra.mrb[0].mxu1 %v255_v37  ;;  %2772 = vmatprep.mubr.f32.mxu0 %v263_v34  ;;  %v264_v58 = vsub.f32 %v4257_v17, %v263_v34 }
  0xbb   :  { %3306 = vmatpush3.bf16.msra.mxu1 %v4169_v30  ;;  %3406 = vmatpush3.bf16.msra.mxu0 %v4089_v57 }
  0xbc   :  { %3308 = vmatprep.subr.bf16.mxu1 %v4125_v11  ;;  %3408 = vmatprep.subr.bf16.mxu0 %v4127_v12  ;;  %v265_v33 = vand.u32 4294901760, %v264_v58  ;;  %v273_v35 = vand.u32 4294901760, %v4265_v46 }
  0xbe   :  { %2658 = vmatprep.mubr.f32.mxu1 %v265_v33  ;;  %2773 = vmatmul.mubr.f32.gmra.mrb[2].mxu0 %v273_v35  ;;  %v274_v47 = vsub.f32 %v4265_v46, %v273_v35 }
  0xbf   :  { %3310 = vmatpush3.bf16.msra.mxu1 %v4125_v11  ;;  %3410 = vmatpush3.bf16.msra.mxu0 %v4127_v12 }
  0xc0   :  { %2807 = vmatprep.mubr.f32.mxu0 %v4242_v36  ;;  %3312 = vmatprep.subr.bf16.mxu1 %v4147_v43  ;;  %v275_v2 = vand.u32 4294901760, %v274_v47 }
  0xc1   :  { %3412 = vmatprep.subr.bf16.mxu0 %v4142_v24 }
  0xc2   :  { %2659 = vmatmul.mubr.f32.gmra.mrb[2].mxu1 %v275_v2 }
  0xc3   :  { %3314 = vmatpush3.bf16.msra.mxu1 %v4147_v43  ;;  %3414 = vmatpush3.bf16.msra.mxu0 %v4142_v24 }
  0xc4   :  { %2693 = vmatprep.mubr.f32.mxu1 %v4242_v36  ;;  %3316 = vmatprep.subr.bf16.mxu1 %v4160_v5 }
  0xc5   :  { %3416 = vmatprep.subr.bf16.mxu0 %v4171_v31 }
  0xc7   :  { %3318 = vmatpush3.bf16.msra.mxu1 %v4160_v5  ;;  %3418 = vmatpush3.bf16.msra.mxu0 %v4171_v31 }
  0xc8   :  { %3320 = vmatprep.subr.bf16.mxu1 %v4179_v40  ;;  %3420 = vmatprep.subr.bf16.mxu0 %v4176_v32 }
  0xcb   :  { %3322 = vmatpush3.bf16.msra.mxu1 %v4179_v40  ;;  %3422 = vmatpush3.bf16.msra.mxu0 %v4176_v32 }
  0xcc   :  { %3324 = vmatprep.subr.bf16.mxu1 %v4187_v25  ;;  %3424 = vmatprep.subr.bf16.mxu0 %v4195_v54 }
  0xcf   :  { %3326 = vmatpush3.bf16.msra.mxu1 %v4187_v25  ;;  %3426 = vmatpush3.bf16.msra.mxu0 %v4195_v54 }
  0xd0   :  { %3328 = vmatprep.subr.bf16.mxu1 %v4199_v60  ;;  %3428 = vmatprep.subr.bf16.mxu0 %v4197_v4 }
  0xd3   :  { %3330 = vmatpush3.bf16.msra.mxu1 %v4199_v60  ;;  %3430 = vmatpush3.bf16.msra.mxu0 %v4197_v4 }
  0xd4   :  { %3332 = vmatprep.subr.bf16.mxu1 %v4201_v62  ;;  %3432 = vmatprep.subr.bf16.mxu0 %v3973_v13 }
  0xd6   :  { %2808 = vmatmul.mubr.f32.vlgmr.msra.gmra.mrb[0].mxu0 %v4240_v49 }
  0xd7   :  { %3334 = vmatpush3.bf16.msra.mxu1 %v4201_v62  ;;  %2810 = vmatprep.mubr.f32.mxu0 %v4252_v27 }
  0xd8   :  { %3434 = vmatpush3.bf16.msra.mxu0 %v3973_v13  ;;  %3336 = vmatprep.subr.bf16.mxu1 %v4205_v53 }
  0xd9   :  { %3436 = vmatprep.subr.bf16.mxu0 %v3975_v15 }
  0xda   :  { %2694 = vmatmul.mubr.f32.vlgmr.msra.gmra.mrb[0].mxu1 %v4240_v49  ;;  %2811 = vmatmul.mubr.f32.gmra.mrb[2].mxu0 %v4260_v42 }
  0xdb   :  { %2696 = vmatprep.mubr.f32.mxu1 %v4252_v27  ;;  %3338 = vmatpush3.bf16.msra.mxu1 %v4205_v53 }
  0xdc   :  { %3438 = vmatpush3.bf16.msra.mxu0 %v3975_v15  ;;  %2845 = vmatprep.mubr.f32.mxu0 %v4242_v36 }
  0xdd   :  { %3340 = vmatprep.subr.bf16.mxu1 %v4209_v3  ;;  %3440 = vmatprep.subr.bf16.mxu0 %v4000_v23 }
  0xde   :  { %2697 = vmatmul.mubr.f32.gmra.mrb[2].mxu1 %v4260_v42 }
  0xdf   :  { %3342 = vmatpush3.bf16.msra.mxu1 %v4209_v3  ;;  %2731 = vmatprep.mubr.f32.mxu1 %v4248_v1 }
  0xe0   :  { %3442 = vmatpush3.bf16.msra.mxu0 %v4000_v23  ;;  %3344 = vmatprep.subr.bf16.mxu1 %v4213_v7 }
  0xe1   :  { %3444 = vmatprep.subr.bf16.mxu0 %v4023_v29 }
  0xe3   :  { %3346 = vmatpush3.bf16.msra.mxu1 %v4213_v7 }
  0xe4   :  { %3446 = vmatpush3.bf16.msra.mxu0 %v4023_v29  ;;  %3348 = vmatprep.subr.bf16.mxu1 %v4217_v10 }
  0xe5   :  { %3448 = vmatprep.subr.bf16.mxu0 %v4047_v38 }
  0xe7   :  { %3350 = vmatpush3.bf16.msra.mxu1 %v4217_v10 }
  0xe8   :  { %3450 = vmatpush3.bf16.msra.mxu0 %v4047_v38  ;;  %3352 = vmatprep.subr.bf16.mxu1 %v4219_v39 }
  0xe9   :  { %3452 = vmatprep.subr.bf16.mxu0 %v4077_v52 }
  0xeb   :  { %3354 = vmatpush3.bf16.msra.mxu1 %v4219_v39 }
  0xec   :  { %3454 = vmatpush3.bf16.msra.mxu0 %v4077_v52  ;;  %3356 = vmatprep.subr.bf16.mxu1 %v4225_v55 }
  0xed   :  { %3456 = vmatprep.subr.bf16.mxu0 %v4101_v61 }
  0xef   :  { %3358 = vmatpush3.bf16.msra.mxu1 %v4225_v55 }
  0xf0   :  { %3458 = vmatpush3.bf16.msra.mxu0 %v4101_v61  ;;  %3360 = vmatprep.subr.bf16.mxu1 %v4227_v59 }
  0xf1   :  { %3460 = vmatprep.subr.bf16.mxu0 %v4138_v19 }
  0xf3   :  { %3362 = vmatpush3.bf16.msra.mxu1 %v4227_v59 }
  0xf4   :  { %3462 = vmatpush3.bf16.msra.mxu0 %v4138_v19  ;;  %3364 = vmatprep.subr.bf16.mxu1 %v4229_v8 }
  0xf5   :  { %3607 = vmatprep.subr.bf16.mxu0 %v3904_v50 }
  0xf7   :  { %2846 = vmatmul.mubr.f32.vlgmr.msra.gmra.mrb[0].mxu0 %v4240_v49  ;;  %3366 = vmatpush3.bf16.msra.mxu1 %v4229_v8  ;;  %v154_v49 = vpop.permute.xlu1 %153 }
  0xf8   :  { %2848 = vmatprep.mubr.f32.mxu0 %v4252_v27  ;;  %3463 = vmatprep.subr.bf16.mxu1 %v3904_v50 }
  0xf9   :  { %3609 = vmatpush3.bf16.msra.mxu0 %v3973_v13 }
  0xfa   :  { %2732 = vmatmul.mubr.f32.vlgmr.msra.gmra.mrb[0].mxu1 %v4245_v45  ;;  %3610 = vmatprep.subr.bf16.mxu0 %v3904_v50  ;;  %v150_v45 = vpop.permute.xlu0 %149 }
  0xfb   :  { %2849 = vmatmul.mubr.f32.gmra.mrb[2].mxu0 %v4260_v42  ;;  %2734 = vmatprep.mubr.f32.mxu1 %v4257_v17  ;;  %v158_v41 = vpop.permute.xlu1 %157 }
  0xfc   :  { %3465 = vmatpush3.bf16.msra.mxu1 %v3973_v13  ;;  %3093 = vmatprep.mubr.msk.f32.mxu0 %vm3905_vm0, %v3906_v56 }
  0xfd   :  { %3466 = vmatprep.subr.bf16.mxu1 %v3904_v50  ;;  %3612 = vmatpush3.bf16.msra.mxu0 %v3975_v15 }
  0xfe   :  { %2735 = vmatmul.mubr.f32.gmra.mrb[2].mxu1 %v4265_v46  ;;  %3613 = vmatprep.subr.bf16.mxu0 %v3904_v50  ;;  %v937_v42 = vpop.permute.xlu0 %936 }
  0xff   :  { %2883 = vmatprep.mubr.msk.f32.mxu1 %vm3905_vm0, %v3906_v56  ;;  %v942_v18 = vpop.permute.xlu1 %941 }
 0x100   :  { %3468 = vmatpush3.bf16.msra.mxu1 %v3975_v15 }
 0x101   :  { %3469 = vmatprep.subr.bf16.mxu1 %v3904_v50  ;;  %3615 = vmatpush3.bf16.msra.mxu0 %v4000_v23 }
 0x102   :  { %3616 = vmatprep.subr.bf16.mxu0 %v3904_v50 }
 0x104   :  { %3471 = vmatpush3.bf16.msra.mxu1 %v4000_v23 }
 0x105   :  { %3472 = vmatprep.subr.bf16.mxu1 %v3904_v50  ;;  %3618 = vmatpush3.bf16.msra.mxu0 %v4023_v29 }
 0x106   :  { %3619 = vmatprep.subr.bf16.mxu0 %v3904_v50 }
 0x108   :  { %3474 = vmatpush3.bf16.msra.mxu1 %v4023_v29 }
 0x109   :  { %3475 = vmatprep.subr.bf16.mxu1 %v3904_v50  ;;  %3621 = vmatpush3.bf16.msra.mxu0 %v4047_v38 }
 0x10a   :  { %3622 = vmatprep.subr.bf16.mxu0 %v3904_v50 }
 0x10c   :  { %3477 = vmatpush3.bf16.msra.mxu1 %v4047_v38 }
 0x10d   :  { %3478 = vmatprep.subr.bf16.mxu1 %v3904_v50  ;;  %3624 = vmatpush3.bf16.msra.mxu0 %v4077_v52 }
 0x10e   :  { %3625 = vmatprep.subr.bf16.mxu0 %v3904_v50 }
 0x110   :  { %3480 = vmatpush3.bf16.msra.mxu1 %v4077_v52 }
 0x111   :  { %3481 = vmatprep.subr.bf16.mxu1 %v3904_v50  ;;  %3627 = vmatpush3.bf16.msra.mxu0 %v4101_v61 }
 0x112   :  { %3628 = vmatprep.subr.bf16.mxu0 %v3904_v50 }
 0x114   :  { %3483 = vmatpush3.bf16.msra.mxu1 %v4101_v61 }
 0x115   :  { %3484 = vmatprep.subr.bf16.mxu1 %v3904_v50  ;;  %3630 = vmatpush3.bf16.msra.mxu0 %v4138_v19 }
 0x116   :  { %3631 = vmatprep.subr.bf16.mxu0 %v3904_v50 }
 0x118   :  { %3486 = vmatpush3.bf16.msra.mxu1 %v4138_v19 }
 0x119   :  { %3487 = vmatprep.subr.bf16.mxu1 %v3904_v50 }
 0x1ca   :  { %v2847_v36 = vpop.f32.mrb[0].mxu0 }
 0x1cb   :  { %v908_v44 = vpop.f32.mrb[1].mxu0 }
 0x1cd   :  { %v2733_v9 = vpop.f32.mrb[0].mxu1 }
 0x1ce   :  { %v3751_v48 = vadd.f32 %v2733_v9, %v150_v45  ;;  %v2850_v1 = vpop.f32.mrb[2].mxu0  ;;  %v550_v22 = vpop.f32.mrb[1].mxu1 }
 0x1cf   :  { %v3753_v28 = vadd.f32 %v550_v22, %v146_v6  ;;  %v920_v51 = vpop.f32.mrb[3].mxu0  ;;  %v947_v45 = vpop.permute.xlu1 %946 }
 0x1d0   :  { %v3752_v26 = vadd.f32 %v3751_v48, %v2847_v36  ;;  %v952_v9 = vpop.permute.xlu0 %951 }
 0x1d1   :  { %v3754_v27 = vadd.f32 %v3753_v28, %v908_v44  ;;  %v2736_v14 = vpop.f32.mrb[2].mxu1 }
 0x1d2   :  { %v931_v20 = vmax.f32 %v3752_v26, 0.0  ;;  %v3755_v17 = vadd.f32 %v2736_v14, %v158_v41  ;;  %v564_v21 = vpop.f32.mrb[3].mxu1 }
 0x1d3   :  { %v930_v16 = vmax.f32 %v3754_v27, 0.0  ;;  %v3757_v37 = vadd.f32 %v564_v21, %v154_v49 }
 0x1d4   :  { %v955_v34 = vmul.f32 %v942_v18, %v931_v20  ;;  %v3756_v46 = vadd.f32 %v3755_v17, %v2850_v1  ;;  %v967_v17 = vstv %s2298_s1 }
 0x1d5   :  { %v954_v58 = vmul.f32 %v937_v42, %v930_v16  ;;  %v3758_v33 = vadd.f32 %v3757_v37, %v920_v51 }
 0x1d6   :  { %v933_v47 = vmax.f32 %v3756_v46, 0.0 }
 0x1d7   :  { %v958_v35 = vadd.f32 %v955_v34, %v954_v58  ;;  %v932_v2 = vmax.f32 %v3758_v33, 0.0 }
 0x1d8   :  { %v957_v36 = vmul.f32 %v952_v9, %v933_v47 }
 0x1d9   :  { %v956_v6 = vmul.f32 %v947_v45, %v932_v2 }
 0x1db   :  { %v959_v44 = vadd.f32 %v958_v35, %v956_v6 }
 0x1dd   :  { %v960_v48 = vadd.f32 %v959_v44, %v957_v36 }
 0x1df   :  { %v961_v22 = vrot.slane %v960_v48, 4 }
 0x1e1   :  { %v962_v28 = vadd.f32 %v961_v22, %v960_v48 }
 0x1e3   :  { %v963_v41 = vrot.slane %v962_v28, 2 }
 0x1e5   :  { %v964_v26 = vadd.f32 %v963_v41, %v962_v28 }
 0x1e7   :  { %v965_v27 = vrot.slane %v964_v26, 1 }
 0x1e9   :  { %v966_v49 = vadd.f32 %v965_v27, %v964_v26 }
 0x1eb   :  { %v4384_v14 = vand.u32 4294901760, %v966_v49 }
 0x1ed   :  { %v1050_v1 = vsub.f32 %v966_v49, %v4384_v14 }
 0x1ef   :  { %v1051_v51 = vand.u32 4294901760, %v1050_v1 }
 0x1f1   :  { %v1052_v18 = vsub.f32 %v1050_v1, %v1051_v51 }
 0x1f3   :  { %v1053_v20 = vand.u32 4294901760, %v1052_v18 }
 0x1f5   :  { %2884 = vmatmul.mubr.f32.vlgmr.msra.gmra.mrb[4].mxu1 %v1053_v20 }
 0x1f6   :  { %3489 = vmatpush3.bf16.msra.mxu1 %v4169_v30  ;;  %2918 = vmatprep.mubr.msk.f32.mxu1 %vm3905_vm0, %v3906_v56 }
 0x1f7   :  { %3490 = vmatprep.subr.bf16.mxu1 %v3904_v50 }
 0x1fa   :  { %3492 = vmatpush3.bf16.msra.mxu1 %v4125_v11 }
 0x1fb   :  { %3493 = vmatprep.subr.bf16.mxu1 %v3904_v50 }
 0x1fe   :  { %3495 = vmatpush3.bf16.msra.mxu1 %v4147_v43 }
 0x1ff   :  { %3496 = vmatprep.subr.bf16.mxu1 %v3904_v50 }
 0x202   :  { %3498 = vmatpush3.bf16.msra.mxu1 %v4160_v5 }
 0x203   :  { %3499 = vmatprep.subr.bf16.mxu1 %v3904_v50 }
 0x206   :  { %3501 = vmatpush3.bf16.msra.mxu1 %v4179_v40 }
 0x207   :  { %3502 = vmatprep.subr.bf16.mxu1 %v3904_v50 }
 0x20a   :  { %3504 = vmatpush3.bf16.msra.mxu1 %v4187_v25 }
 0x20b   :  { %3505 = vmatprep.subr.bf16.mxu1 %v3904_v50 }
 0x20e   :  { %3507 = vmatpush3.bf16.msra.mxu1 %v4199_v60 }
 0x20f   :  { %3508 = vmatprep.subr.bf16.mxu1 %v3904_v50 }
 0x212   :  { %3510 = vmatpush3.bf16.msra.mxu1 %v4201_v62 }
 0x213   :  { %3511 = vmatprep.subr.bf16.mxu1 %v3904_v50 }
 0x215   :  { %2919 = vmatmul.mubr.f32.vlgmr.msra.gmra.mrb[4].mxu1 %v4384_v14 }
 0x216   :  { %3513 = vmatpush3.bf16.msra.mxu1 %v4205_v53  ;;  %2953 = vmatprep.mubr.msk.f32.mxu1 %vm3905_vm0, %v3906_v56 }
 0x217   :  { %3514 = vmatprep.subr.bf16.mxu1 %v3904_v50 }
 0x21a   :  { %3516 = vmatpush3.bf16.msra.mxu1 %v4209_v3 }
 0x21b   :  { %3517 = vmatprep.subr.bf16.mxu1 %v3904_v50 }
 0x21e   :  { %3519 = vmatpush3.bf16.msra.mxu1 %v4213_v7 }
 0x21f   :  { %3520 = vmatprep.subr.bf16.mxu1 %v3904_v50 }
 0x222   :  { %3522 = vmatpush3.bf16.msra.mxu1 %v4217_v10 }
 0x223   :  { %3523 = vmatprep.subr.bf16.mxu1 %v3904_v50 }
 0x226   :  { %3525 = vmatpush3.bf16.msra.mxu1 %v4219_v39 }
 0x227   :  { %3526 = vmatprep.subr.bf16.mxu1 %v3904_v50 }
 0x22a   :  { %3528 = vmatpush3.bf16.msra.mxu1 %v4225_v55 }
 0x22b   :  { %3529 = vmatprep.subr.bf16.mxu1 %v3904_v50 }
 0x22e   :  { %3531 = vmatpush3.bf16.msra.mxu1 %v4227_v59 }
 0x22f   :  { %3532 = vmatprep.subr.bf16.mxu1 %v3904_v50 }
 0x232   :  { %3534 = vmatpush3.bf16.msra.mxu1 %v4229_v8 }
 0x233   :  { %3535 = vmatprep.subr.bf16.mxu1 %v3904_v50 }
 0x235   :  { %2954 = vmatmul.mubr.f32.vlgmr.msra.gmra.mrb[4].mxu1 %v1050_v1 }
 0x236   :  { %3537 = vmatpush3.bf16.msra.mxu1 %v3973_v13  ;;  %2988 = vmatprep.mubr.msk.f32.mxu1 %vm3905_vm0, %v3906_v56 }
 0x237   :  { %3538 = vmatprep.subr.bf16.mxu1 %v3904_v50 }
 0x23a   :  { %3540 = vmatpush3.bf16.msra.mxu1 %v3975_v15 }
 0x23b   :  { %3541 = vmatprep.subr.bf16.mxu1 %v3904_v50 }
 0x23e   :  { %3543 = vmatpush3.bf16.msra.mxu1 %v4000_v23 }
 0x23f   :  { %3544 = vmatprep.subr.bf16.mxu1 %v3904_v50 }
 0x242   :  { %3546 = vmatpush3.bf16.msra.mxu1 %v4023_v29 }
 0x243   :  { %3547 = vmatprep.subr.bf16.mxu1 %v3904_v50 }
 0x246   :  { %3549 = vmatpush3.bf16.msra.mxu1 %v4047_v38 }
 0x247   :  { %3550 = vmatprep.subr.bf16.mxu1 %v3904_v50 }
 0x24a   :  { %3552 = vmatpush3.bf16.msra.mxu1 %v4077_v52 }
 0x24b   :  { %3553 = vmatprep.subr.bf16.mxu1 %v3904_v50 }
 0x24e   :  { %3555 = vmatpush3.bf16.msra.mxu1 %v4101_v61 }
 0x24f   :  { %3556 = vmatprep.subr.bf16.mxu1 %v3904_v50 }
 0x252   :  { %3558 = vmatpush3.bf16.msra.mxu1 %v4138_v19 }
 0x253   :  { %3559 = vmatprep.subr.bf16.mxu1 %v3904_v50 }
 0x255   :  { %2989 = vmatmul.mubr.f32.vlgmr.msra.gmra.mrb[4].mxu1 %v1051_v51 }
 0x256   :  { %3561 = vmatpush3.bf16.msra.mxu1 %v4156_v63  ;;  %3023 = vmatprep.mubr.msk.f32.mxu1 %vm3905_vm0, %v3906_v56 }
 0x257   :  { %3562 = vmatprep.subr.bf16.mxu1 %v3904_v50 }
 0x25a   :  { %3564 = vmatpush3.bf16.msra.mxu1 %v4089_v57 }
 0x25b   :  { %3565 = vmatprep.subr.bf16.mxu1 %v3904_v50 }
 0x25e   :  { %3567 = vmatpush3.bf16.msra.mxu1 %v4127_v12 }
 0x25f   :  { %3568 = vmatprep.subr.bf16.mxu1 %v3904_v50 }
 0x262   :  { %3570 = vmatpush3.bf16.msra.mxu1 %v4142_v24 }
 0x263   :  { %3571 = vmatprep.subr.bf16.mxu1 %v3904_v50 }
 0x266   :  { %3573 = vmatpush3.bf16.msra.mxu1 %v4171_v31 }
 0x267   :  { %3574 = vmatprep.subr.bf16.mxu1 %v3904_v50 }
 0x26a   :  { %3576 = vmatpush3.bf16.msra.mxu1 %v4176_v32 }
 0x26b   :  { %3577 = vmatprep.subr.bf16.mxu1 %v3904_v50 }
 0x26e   :  { %3579 = vmatpush3.bf16.msra.mxu1 %v4195_v54 }
 0x26f   :  { %3580 = vmatprep.subr.bf16.mxu1 %v3904_v50 }
 0x272   :  { %3582 = vmatpush3.bf16.msra.mxu1 %v4197_v4 }
 0x273   :  { %3583 = vmatprep.subr.bf16.mxu1 %v3904_v50 }
 0x275   :  { %3024 = vmatmul.mubr.f32.vlgmr.msra.gmra.mrb[4].mxu1 %v4384_v14 }
 0x276   :  { %3585 = vmatpush3.bf16.msra.mxu1 %v3973_v13  ;;  %3058 = vmatprep.mubr.msk.f32.mxu1 %vm3905_vm0, %v3906_v56 }
 0x277   :  { %3586 = vmatprep.subr.bf16.mxu1 %v3904_v50 }
 0x27a   :  { %3588 = vmatpush3.bf16.msra.mxu1 %v3975_v15 }
 0x27b   :  { %3589 = vmatprep.subr.bf16.mxu1 %v3904_v50 }
 0x27e   :  { %3591 = vmatpush3.bf16.msra.mxu1 %v4000_v23 }
 0x27f   :  { %3592 = vmatprep.subr.bf16.mxu1 %v3904_v50 }
 0x282   :  { %3594 = vmatpush3.bf16.msra.mxu1 %v4023_v29 }
 0x283   :  { %3595 = vmatprep.subr.bf16.mxu1 %v3904_v50 }
 0x286   :  { %3597 = vmatpush3.bf16.msra.mxu1 %v4047_v38 }
 0x287   :  { %3598 = vmatprep.subr.bf16.mxu1 %v3904_v50 }
 0x28a   :  { %3600 = vmatpush3.bf16.msra.mxu1 %v4077_v52 }
 0x28b   :  { %3601 = vmatprep.subr.bf16.mxu1 %v3904_v50 }
 0x28e   :  { %3603 = vmatpush3.bf16.msra.mxu1 %v4101_v61 }
 0x28f   :  { %3604 = vmatprep.subr.bf16.mxu1 %v3904_v50 }
 0x292   :  { %3606 = vmatpush3.bf16.msra.mxu1 %v4138_v19 }
 0x295   :  { %3059 = vmatmul.mubr.f32.vlgmr.msra.gmra.mrb[4].mxu1 %v4384_v14 }
 0x368   :  { %v1605_v21 = vpop.f32.mrb[4].mxu1 }
 0x369   :  { %v4479_v16 = vadd.f32 %v1605_v21, %v967_v17  ;;  %v3060_v37 = vpop.f32.mrb[5].mxu1 }
 0x36b   :  { %v4482_v42 = vand.u32 4294901760, %v4479_v16 }
 0x36d   :  { %v1691_v34 = vsub.f32 %v4479_v16, %v4482_v42 }
 0x36f   :  { %v1692_v46 = vand.u32 4294901760, %v1691_v34 }
 0x371   :  { %v1693_v58 = vsub.f32 %v1691_v34, %v1692_v46 }
 0x373   :  { %v1694_v33 = vand.u32 4294901760, %v1693_v58 }
 0x375   :  { %3094 = vmatmul.mubr.f32.vlgmr.msra.gmra.mrb[4].mxu0 %v1694_v33 }
 0x376   :  { %3633 = vmatpush3.bf16.msra.mxu0 %v4169_v30  ;;  %3128 = vmatprep.mubr.msk.f32.mxu0 %vm3905_vm0, %v3906_v56 }
 0x377   :  { %3634 = vmatprep.subr.bf16.mxu0 %v3904_v50 }
 0x37a   :  { %3636 = vmatpush3.bf16.msra.mxu0 %v4125_v11 }
 0x37b   :  { %3637 = vmatprep.subr.bf16.mxu0 %v3904_v50 }
 0x37e   :  { %3639 = vmatpush3.bf16.msra.mxu0 %v4147_v43 }
 0x37f   :  { %3640 = vmatprep.subr.bf16.mxu0 %v3904_v50 }
 0x382   :  { %3642 = vmatpush3.bf16.msra.mxu0 %v4160_v5 }
 0x383   :  { %3643 = vmatprep.subr.bf16.mxu0 %v3904_v50 }
 0x386   :  { %3645 = vmatpush3.bf16.msra.mxu0 %v4179_v40 }
 0x387   :  { %3646 = vmatprep.subr.bf16.mxu0 %v3904_v50 }
 0x38a   :  { %3648 = vmatpush3.bf16.msra.mxu0 %v4187_v25 }
 0x38b   :  { %3649 = vmatprep.subr.bf16.mxu0 %v3904_v50 }
 0x38e   :  { %3651 = vmatpush3.bf16.msra.mxu0 %v4199_v60 }
 0x38f   :  { %3652 = vmatprep.subr.bf16.mxu0 %v3904_v50 }
 0x392   :  { %3654 = vmatpush3.bf16.msra.mxu0 %v4201_v62 }
 0x393   :  { %3655 = vmatprep.subr.bf16.mxu0 %v3904_v50 }
 0x395   :  { %3129 = vmatmul.mubr.f32.vlgmr.msra.gmra.mrb[4].mxu0 %v4482_v42 }
 0x396   :  { %3657 = vmatpush3.bf16.msra.mxu0 %v4205_v53  ;;  %3163 = vmatprep.mubr.msk.f32.mxu0 %vm3905_vm0, %v3906_v56 }
 0x397   :  { %3658 = vmatprep.subr.bf16.mxu0 %v3904_v50 }
 0x39a   :  { %3660 = vmatpush3.bf16.msra.mxu0 %v4209_v3 }
 0x39b   :  { %3661 = vmatprep.subr.bf16.mxu0 %v3904_v50 }
 0x39e   :  { %3663 = vmatpush3.bf16.msra.mxu0 %v4213_v7 }
 0x39f   :  { %3664 = vmatprep.subr.bf16.mxu0 %v3904_v50 }
 0x3a2   :  { %3666 = vmatpush3.bf16.msra.mxu0 %v4217_v10 }
 0x3a3   :  { %3667 = vmatprep.subr.bf16.mxu0 %v3904_v50 }
 0x3a6   :  { %3669 = vmatpush3.bf16.msra.mxu0 %v4219_v39 }
 0x3a7   :  { %3670 = vmatprep.subr.bf16.mxu0 %v3904_v50 }
 0x3aa   :  { %3672 = vmatpush3.bf16.msra.mxu0 %v4225_v55 }
 0x3ab   :  { %3673 = vmatprep.subr.bf16.mxu0 %v3904_v50 }
 0x3ae   :  { %3675 = vmatpush3.bf16.msra.mxu0 %v4227_v59 }
 0x3af   :  { %3676 = vmatprep.subr.bf16.mxu0 %v3904_v50 }
 0x3b2   :  { %3678 = vmatpush3.bf16.msra.mxu0 %v4229_v8 }
 0x3b3   :  { %3679 = vmatprep.subr.bf16.mxu0 %v3904_v50 }
 0x3b5   :  { %3164 = vmatmul.mubr.f32.vlgmr.msra.gmra.mrb[4].mxu0 %v1691_v34 }
 0x3b6   :  { %3681 = vmatpush3.bf16.msra.mxu0 %v3973_v13  ;;  %3198 = vmatprep.mubr.msk.f32.mxu0 %vm3905_vm0, %v3906_v56 }
 0x3b7   :  { %3682 = vmatprep.subr.bf16.mxu0 %v3904_v50 }
 0x3ba   :  { %3684 = vmatpush3.bf16.msra.mxu0 %v3975_v15 }
 0x3bb   :  { %3685 = vmatprep.subr.bf16.mxu0 %v3904_v50 }
 0x3be   :  { %3687 = vmatpush3.bf16.msra.mxu0 %v4000_v23 }
 0x3bf   :  { %3688 = vmatprep.subr.bf16.mxu0 %v3904_v50 }
 0x3c2   :  { %3690 = vmatpush3.bf16.msra.mxu0 %v4023_v29 }
 0x3c3   :  { %3691 = vmatprep.subr.bf16.mxu0 %v3904_v50 }
 0x3c6   :  { %3693 = vmatpush3.bf16.msra.mxu0 %v4047_v38 }
 0x3c7   :  { %3694 = vmatprep.subr.bf16.mxu0 %v3904_v50 }
 0x3ca   :  { %3696 = vmatpush3.bf16.msra.mxu0 %v4077_v52 }
 0x3cb   :  { %3697 = vmatprep.subr.bf16.mxu0 %v3904_v50 }
 0x3ce   :  { %3699 = vmatpush3.bf16.msra.mxu0 %v4101_v61 }
 0x3cf   :  { %3700 = vmatprep.subr.bf16.mxu0 %v3904_v50 }
 0x3d2   :  { %3702 = vmatpush3.bf16.msra.mxu0 %v4138_v19 }
 0x3d3   :  { %3703 = vmatprep.subr.bf16.mxu0 %v3904_v50 }
 0x3d5   :  { %3199 = vmatmul.mubr.f32.vlgmr.msra.gmra.mrb[4].mxu0 %v1692_v46 }
 0x3d6   :  { %3705 = vmatpush3.bf16.msra.mxu0 %v4156_v63  ;;  %3233 = vmatprep.mubr.msk.f32.mxu0 %vm3905_vm0, %v3906_v56 }
 0x3d7   :  { %3706 = vmatprep.subr.bf16.mxu0 %v3904_v50 }
 0x3da   :  { %3708 = vmatpush3.bf16.msra.mxu0 %v4089_v57 }
 0x3db   :  { %3709 = vmatprep.subr.bf16.mxu0 %v3904_v50 }
 0x3de   :  { %3711 = vmatpush3.bf16.msra.mxu0 %v4127_v12 }
 0x3df   :  { %3712 = vmatprep.subr.bf16.mxu0 %v3904_v50 }
 0x3e2   :  { %3714 = vmatpush3.bf16.msra.mxu0 %v4142_v24 }
 0x3e3   :  { %3715 = vmatprep.subr.bf16.mxu0 %v3904_v50 }
 0x3e6   :  { %3717 = vmatpush3.bf16.msra.mxu0 %v4171_v31 }
 0x3e7   :  { %3718 = vmatprep.subr.bf16.mxu0 %v3904_v50 }
 0x3ea   :  { %3720 = vmatpush3.bf16.msra.mxu0 %v4176_v32 }
 0x3eb   :  { %3721 = vmatprep.subr.bf16.mxu0 %v3904_v50 }
 0x3ee   :  { %3723 = vmatpush3.bf16.msra.mxu0 %v4195_v54 }
 0x3ef   :  { %3724 = vmatprep.subr.bf16.mxu0 %v3904_v50 }
 0x3f2   :  { %3726 = vmatpush3.bf16.msra.mxu0 %v4197_v4 }
 0x3f3   :  { %3727 = vmatprep.subr.bf16.mxu0 %v3904_v50 }
 0x3f5   :  { %3234 = vmatmul.mubr.f32.vlgmr.msra.gmra.mrb[4].mxu0 %v4482_v42 }
 0x3f6   :  { %3729 = vmatpush3.bf16.msra.mxu0 %v3973_v13  ;;  %3268 = vmatprep.mubr.msk.f32.mxu0 %vm3905_vm0, %v3906_v56 }
 0x3f7   :  { %3730 = vmatprep.subr.bf16.mxu0 %v3904_v50 }
 0x3fa   :  { %3732 = vmatpush3.bf16.msra.mxu0 %v3975_v15 }
 0x3fb   :  { %3733 = vmatprep.subr.bf16.mxu0 %v3904_v50 }
 0x3fe   :  { %3735 = vmatpush3.bf16.msra.mxu0 %v4000_v23 }
 0x3ff   :  { %3736 = vmatprep.subr.bf16.mxu0 %v3904_v50 }
 0x402   :  { %3738 = vmatpush3.bf16.msra.mxu0 %v4023_v29 }
 0x403   :  { %3739 = vmatprep.subr.bf16.mxu0 %v3904_v50 }
 0x406   :  { %3741 = vmatpush3.bf16.msra.mxu0 %v4047_v38 }
 0x407   :  { %3742 = vmatprep.subr.bf16.mxu0 %v3904_v50 }
 0x40a   :  { %3744 = vmatpush3.bf16.msra.mxu0 %v4077_v52 }
 0x40b   :  { %3745 = vmatprep.subr.bf16.mxu0 %v3904_v50 }
 0x40e   :  { %3747 = vmatpush3.bf16.msra.mxu0 %v4101_v61 }
 0x40f   :  { %3748 = vmatprep.subr.bf16.mxu0 %v3904_v50 }
 0x412   :  { %3750 = vmatpush3.bf16.msra.mxu0 %v4138_v19 }
 0x415   :  { %3269 = vmatmul.mubr.f32.vlgmr.msra.gmra.mrb[4].mxu0 %v4482_v42 }
 0x4e8   :  { %v2246_v13 = vpop.f32.mrb[4].mxu0 }
 0x4e9   :  { %v2250_v15 = vmul.f32 %v2246_v13, %v2246_v13  ;;  %v2262_v23 = vmul.f32 %v2246_v13, %v4234_v0  ;;  %v3270_v29 = vpop.f32.mrb[5].mxu0 }
 0x4eb   :  { %v2263_v38 = vsel %vm2251_vm1, %v2262_v23, 0.0  ;;  %v2252_v57 = vsel %vm2251_vm1, %v2250_v15, 0.0 }
 0x4ec   :  { %2264 = vadd.xlane.f32.xlu0 %v2263_v38  ;;  %2253 = vadd.xlane.f32.xlu1 %v2252_v57 }
 0x579   :  { %v2265_v52 = vpop.xlane.xlu0 %2264  ;;  %v2254_v11 = vpop.xlane.xlu1 %2253 }
 0x57a   :  { %v2266_v12 = vrot.slane %v2265_v52, 4  ;;  %v2255_v61 = vrot.slane %v2254_v11, 4 }
 0x57c   :  { %v2267_v24 = vadd.f32 %v2266_v12, %v2265_v52  ;;  %v2256_v43 = vadd.f32 %v2255_v61, %v2254_v11 }
 0x57e   :  { %v2268_v63 = vrot.slane %v2267_v24, 2  ;;  %v2257_v19 = vrot.slane %v2256_v43, 2 }
 0x580   :  { %v2269_v5 = vadd.f32 %v2268_v63, %v2267_v24  ;;  %v2258_v30 = vadd.f32 %v2257_v19, %v2256_v43 }
 0x582   :  { %v2259_v31 = vrot.slane %v2258_v30, 1  ;;  %v2270_v32 = vrot.slane %v2269_v5, 1 }
 0x584   :  { %v2260_v40 = vadd.f32 %v2259_v31, %v2258_v30  ;;  %v2271_v25 = vadd.f32 %v2270_v32, %v2269_v5 }
 0x586   :  { %3800 = vpush %v2260_v40 }
 0x587   :  { %3802 = vpush %v2271_v25 }
 0x5b7   :  { %s3801_s21 = spop %3800 }
 0x5b8   :  { %v2273_v54 = vstv %s3801_s21  ;;  %s3803_s22 = spop %3802 }
 0x5b9   :  { %3832 = vrcp.f32 %v2273_v54 }
 0x5c3   :  { %v3833_v4 = vpop.eup %3832 }
 0x5c4   :  { %3804 = vpush %v3833_v4 }
 0x5f5   :  { %s3805_s23 = spop %3804 }
 0x5f6   :  { %s2276_s24 = smul.f32 %s3805_s23, %s3803_s22 }
 0x5f8   :  { %s2277_s27 = smax.f32 %s3908_s0, %s2276_s24 }
 0x5f9   :  { %v2278_v60 = vstv %s2277_s27 }
 0x5fa   :  { %v2279_v62 = vmul.f32 %v4479_v16, %v2278_v60 }
 0x5fc   :  { %2280 = vst [vmem:[#allocation7] sm:$0x1] %v2279_v62 }
 0x5fd   :  { %3879 = shalt.err (!%p3876_p3)
}
 0x5fe   :  { %s3880_s6 = scalar_lea.hbm %s4596_s4, 16 }
 0x5ff   :  { %p3881_p4 = scmp.ne.s32.totalorder %s4596_s4, %s3880_s6  ;;  %p3884_p5 = scmp.lt.u32.totalorder %s3880_s6, %s4596_s4 }
 0x601   :  { %p3886_p6 = pnand %p3884_p5, %p3881_p4 }
 0x603   :  { %3889 = shalt.err (!%p3886_p6)
}
 0x604   :  { %2290 = dma.vmem_to_hbm [thread:$0]  %s2288_s26, 16, %s4596_s4, [#allocation4]  }
 0x605   :  { %3894 = dma.done.wait [#allocation4], 16  }
 0x606   :  { %3895 = vsyncadd [#allocation4], 4294967280 }
 0x607   :  { %2294 = vsyncpa [#allocation3], 1 }
 0x608   :  { %2295 = vsyncpa [#allocation4], 1 }
 0x609   :  { %2296 = vsyncpa [#allocation5], 1 }

</bundles_post_ra>
